<compile_context>
chip_gen: v6e
topology: v6e:2x2x1
jax: 0.10.0
libtpu: 0.0.40
codegen_flags: <defaults>
</compile_context>

<pallas_src>
import functools

import jax
import jax.numpy as jnp
from jax.experimental import pallas as pl
from jax.experimental.pallas import tpu as pltpu


def _round_up(x, m):
    return ((x + m - 1) // m) * m


def _extraction_kernel(xc_ref, wc_ref, bc_ref, wf_ref, bf_ref,
                       feat_ref, out_ref, acc_ref, *, hw):
    """Grid = (batch element n, spatial chunk s); both axes 'arbitrary'.

    xc_ref : (chunk_rows, 9*C_in)  bf16 im2col rows of chunk s of image n
    wc_ref : (9*C_in, C_pad)       bf16 conv weight (lane-padded with zeros)
    bc_ref : (1, C_pad)            f32 conv bias (lane-padded with zeros)
    wf_ref : (C_pad, NC_pad)       bf16 fc weight (transposed, zero-padded)
    bf_ref : (1, NC_pad)           f32 fc bias (zero-padded)
    feat_ref: (N_pad8, C_pad)      f32 'features' hook output (avg pool)
    out_ref : (N_pad8, NC_pad)     f32 'out' hook output (classifier logits)
    acc_ref : (N_pad8, C_pad)      f32 pooled-sum accumulator scratch
    """
    n = pl.program_id(0)
    s = pl.program_id(1)
    last_n = pl.num_programs(0) - 1
    last_s = pl.num_programs(1) - 1

    @pl.when(jnp.logical_and(n == 0, s == 0))
    def _init():
        acc_ref[...] = jnp.zeros_like(acc_ref)

    # Fused conv-as-im2col matmul for this chunk: bf16 x bf16 -> f32 on MXU.
    a = jnp.dot(xc_ref[...], wc_ref[...], preferred_element_type=jnp.float32)
    a = jnp.maximum(a + bc_ref[...], 0.0)                 # bias + ReLU

    # Partial global-average-pool (sum) for batch element n.
    part = jnp.sum(a, axis=0, keepdims=True)              # (1, C_pad)
    acc_ref[pl.ds(n, 1), :] = acc_ref[pl.ds(n, 1), :] + part

    @pl.when(jnp.logical_and(n == last_n, s == last_s))
    def _finalize():
        feat = acc_ref[...] * (1.0 / hw)                   # (N_pad8, C_pad)
        feat_ref[...] = feat.astype(feat_ref.dtype)
        # Replaced classifier head: one MXU pass for the whole padded batch,
        # lane-dense full-tile output store.
        logits = jnp.dot(feat.astype(wf_ref.dtype), wf_ref[...],
                         preferred_element_type=jnp.float32) + bf_ref[...]
        out_ref[...] = logits.astype(out_ref.dtype)


def extraction_wrapper_forward(x_nchw, params, output_subset=None,
                               returnt="out"):
    """Pallas-backed equivalent of ExtractionWrapper.forward.

    x_nchw: [N, C_in, H, W] float32 (PyTorch layout).
    params: dict with conv/fc weights (the fc is the replaced classifier).
    Returns outputs[returnt] (list-of-keys supported), with optional
    output_subset applied to 'out' exactly like the PyTorch wrapper.
    """
    w_conv = params["w_conv"]      # [3, 3, C_in, C_feat]  (HWIO)
    b_conv = params["b_conv"]      # [C_feat]
    w_fc = params["w_fc"]          # [NC, C_feat]  (PyTorch Linear layout)
    b_fc = params["b_fc"]          # [NC]

    N, C_in, H, W = x_nchw.shape
    C_feat = w_conv.shape[-1]
    NC = w_fc.shape[0]
    HW = H * W
    K = 9 * C_in

    # TODO(synk): ragged HW (not a multiple of 8) needs masked pooling rows.
    assert HW % 8 == 0, "H*W must be a multiple of 8 for sublane alignment"

    # Lane-dense padding of the channel/class axes (zero-padded, semantics
    # preserved; sliced off after the kernel).  The batch is padded to 8 rows
    # so the fc head is a single unmasked (8,128)-aligned MXU pass.
    C_pad = _round_up(C_feat, 128)
    NC_pad = _round_up(NC, 128)
    N_pad = _round_up(max(N, 8), 8)

    # --- Glue: bf16 im2col (halves the dominant HBM stream vs f32) ----------
    x_bf = x_nchw.astype(jnp.bfloat16)
    x_nhwc = jnp.transpose(x_bf, (0, 2, 3, 1))
    xp = jnp.pad(x_nhwc, ((0, 0), (1, 1), (1, 1), (0, 0)))
    patches = [xp[:, ky:ky + H, kx:kx + W, :]
               for ky in range(3) for kx in range(3)]
    x_cols = jnp.concatenate(patches, axis=-1).reshape(N * HW, K)   # bf16

    # Conv weight as (9*C_in, C_pad), same (ky, kx, ci) row order as x_cols.
    wc_mat = jnp.pad(w_conv.reshape(K, C_feat),
                     ((0, 0), (0, C_pad - C_feat))).astype(jnp.bfloat16)
    bc = jnp.pad(b_conv, (0, C_pad - C_feat)).reshape(1, C_pad).astype(jnp.float32)

    # fc weight transposed to (C_feat, NC), zero-padded on both axes.
    wf_t = jnp.pad(jnp.transpose(w_fc),
                   ((0, C_pad - C_feat), (0, NC_pad - NC))).astype(jnp.bfloat16)
    bf = jnp.pad(b_fc, (0, NC_pad - NC)).reshape(1, NC_pad).astype(jnp.float32)

    # --- Grid: (batch element, spatial chunk).  Chunk capped at ~1024 rows so
    # the double-buffered bf16 x-block + (chunk, C_pad) f32 activation stay
    # far under VMEM on every generation (v7x 64 MiB, v5e 16 MiB scoped).
    MAX_ROWS = 1024
    S = 1
    if HW > MAX_ROWS:
        S = HW // MAX_ROWS
        while S > 1 and (HW % S != 0 or (HW // S) % 8 != 0):
            S -= 1
    chunk_rows = HW // S

    kernel = functools.partial(_extraction_kernel, hw=HW)

    feats_p, out_p = pl.pallas_call(
        kernel,
        out_shape=(
            jax.ShapeDtypeStruct((N_pad, C_pad), jnp.float32),
            jax.ShapeDtypeStruct((N_pad, NC_pad), jnp.float32),
        ),
        grid_spec=pltpu.PrefetchScalarGridSpec(
            num_scalar_prefetch=0,
            grid=(N, S),
            in_specs=[
                pl.BlockSpec((chunk_rows, K), lambda n, s: (n * S + s, 0)),
                pl.BlockSpec((K, C_pad), lambda n, s: (0, 0)),
                pl.BlockSpec((1, C_pad), lambda n, s: (0, 0)),
                pl.BlockSpec((C_pad, NC_pad), lambda n, s: (0, 0)),
                pl.BlockSpec((1, NC_pad), lambda n, s: (0, 0)),
            ],
            out_specs=[
                # Full-array resident output blocks (constant index map):
                # written once at the last grid step -> unmasked lane-dense
                # stores, no per-step (1, C_pad) sub-tile writes.
                pl.BlockSpec((N_pad, C_pad), lambda n, s: (0, 0)),
                pl.BlockSpec((N_pad, NC_pad), lambda n, s: (0, 0)),
            ],
            scratch_shapes=[pltpu.VMEM((N_pad, C_pad), jnp.float32)],
        ),
        compiler_params=pltpu.CompilerParams(
            # Sequential grid: at these sizes a megacore split is pure
            # per-step overhead (work-gate per review); outputs are a single
            # resident accumulator anyway.
            dimension_semantics=("arbitrary", "arbitrary"),
            vmem_limit_bytes=32 * 1024 * 1024),
    )(x_cols, wc_mat, bc, wf_t, bf)

    feats = feats_p[:N, :C_feat]
    out = out_p[:N, :NC]

    # Hook dict, matching ExtractionWrapper.outputs.  'features' in PyTorch is
    # the raw AdaptiveAvgPool2d output [N, C, 1, 1]; keep that shape.
    outputs = {
        "features": feats.reshape(N, C_feat, 1, 1),
        "out": out,
    }

    if isinstance(returnt, list):
        res = []
        for key in returnt:
            if output_subset is not None and key == "out":
                res.append(outputs[key][..., jnp.asarray(output_subset)])
            else:
                res.append(outputs[key])
        return res
    if output_subset is not None:
        return outputs[returnt][..., jnp.asarray(output_subset)]
    return outputs[returnt]


def _reference_forward(x_nchw, params):
    """Pure-JAX reference (bf16-rounded inputs, f32 math) for correctness."""
    f32 = jnp.float32
    xq = x_nchw.astype(jnp.bfloat16).astype(f32)
    wcq = params["w_conv"].astype(jnp.bfloat16).astype(f32)
    wfq = params["w_fc"].astype(jnp.bfloat16).astype(f32)

    x_nhwc = jnp.transpose(xq, (0, 2, 3, 1))
    conv = jax.lax.conv_general_dilated(
        x_nhwc, wcq, window_strides=(1, 1), padding="SAME",
        dimension_numbers=("NHWC", "HWIO", "NHWC"),
        precision=jax.lax.Precision.HIGHEST)
    conv = jnp.maximum(conv + params["b_conv"], 0.0)
    feat = conv.mean(axis=(1, 2))                              # [N, C_feat]
    featq = feat.astype(jnp.bfloat16).astype(f32)              # mirror kernel fc input
    out = jnp.dot(featq, wfq.T,
                  precision=jax.lax.Precision.HIGHEST) + params["b_fc"]
    return feat, out


if __name__ == "__main__":
    # Small shapes consistent with the module: NCHW input, conv backbone,
    # replaced fc head with num_classes outputs.
    N, C_IN, H, W = 2, 4, 16, 16
    C_FEAT = 32          # backbone feature width (fc.in_features)
    NUM_CLASSES = 10     # ExtractionWrapper(num_classes=10, replace_output=True)

    key = jax.random.PRNGKey(0)
    kx, kwc, kbc, kwf, kbf = jax.random.split(key, 5)

    x = jax.random.normal(kx, (N, C_IN, H, W), dtype=jnp.float32)
    params = {
        "w_conv": jax.random.normal(kwc, (3, 3, C_IN, C_FEAT),
                                    dtype=jnp.float32) * 0.1,
        "b_conv": jax.random.normal(kbc, (C_FEAT,), dtype=jnp.float32) * 0.1,
        "w_fc": jax.random.normal(kwf, (NUM_CLASSES, C_FEAT),
                                  dtype=jnp.float32) * 0.1,
        "b_fc": jax.random.normal(kbf, (NUM_CLASSES,), dtype=jnp.float32) * 0.1,
    }

    # Default forward: returnt='out', output_subset=None  -> logits [N, NC]
    out = extraction_wrapper_forward(x, params)
    out = jax.block_until_ready(out)

    # Multi-hook / subset path, like forward(x, subset, ['features', 'out'])
    feats, out_sub = extraction_wrapper_forward(
        x, params, output_subset=[1, 3, 5], returnt=["features", "out"])
    feats = jax.block_until_ready(feats)
    out_sub = jax.block_until_ready(out_sub)

    # Correctness vs pure-JAX reference (bf16-rounded inputs, f32 accumulate).
    ref_feat, ref_out = _reference_forward(x, params)
    assert out.shape == (N, NUM_CLASSES)
    assert feats.shape == (N, C_FEAT, 1, 1)
    assert out_sub.shape == (N, 3)
    assert jnp.allclose(out, ref_out, atol=5e-3, rtol=5e-3)
    assert jnp.allclose(feats.reshape(N, C_FEAT), ref_feat, atol=5e-3, rtol=5e-3)
    assert jnp.allclose(out_sub, ref_out[..., jnp.asarray([1, 3, 5])],
                        atol=5e-3, rtol=5e-3)

    print("KERNEL_OK")
</pallas_src>

<mosaic_0001>
module attributes {stable_mosaic.version = 11 : i64} {
  func.func @_extraction_kernel(%arg0: i32, %arg1: i32, %arg2: memref<256x36xbf16, #tpu.memory_space<vmem>>, %arg3: memref<36x128xbf16, #tpu.memory_space<vmem>>, %arg4: memref<1x128xf32, #tpu.memory_space<vmem>>, %arg5: memref<128x128xbf16, #tpu.memory_space<vmem>>, %arg6: memref<1x128xf32, #tpu.memory_space<vmem>>, %arg7: memref<8x128xf32, #tpu.memory_space<vmem>>, %arg8: memref<8x128xf32, #tpu.memory_space<vmem>>, %arg9: memref<8x128xf32, #tpu.memory_space<vmem>>) attributes {dimension_semantics = [#tpu.dimension_semantics<arbitrary>, #tpu.dimension_semantics<arbitrary>], iteration_bounds = array<i64: 2, 1>, scalar_prefetch = 0 : i64, scratch_operands = 1 : i64, tpu.core_type = #tpu.core_type<tc>, window_params = [{transform_indices = @transform_0, window_bounds = array<i64: 256, 36>}, {pipeline_mode = #tpu.pipeline_mode<synchronous>, transform_indices = @transform_1, window_bounds = array<i64: 36, 128>}, {pipeline_mode = #tpu.pipeline_mode<synchronous>, transform_indices = @transform_2, window_bounds = array<i64: 1, 128>}, {pipeline_mode = #tpu.pipeline_mode<synchronous>, transform_indices = @transform_3, window_bounds = array<i64: 128, 128>}, {pipeline_mode = #tpu.pipeline_mode<synchronous>, transform_indices = @transform_4, window_bounds = array<i64: 1, 128>}, {pipeline_mode = #tpu.pipeline_mode<synchronous>, transform_indices = @transform_5, window_bounds = array<i64: 8, 128>}, {pipeline_mode = #tpu.pipeline_mode<synchronous>, transform_indices = @transform_6, window_bounds = array<i64: 8, 128>}]} {
    %c0_i32 = arith.constant 0 : i32
    %0 = arith.cmpi eq, %arg0, %c0_i32 : i32
    %c0_i32_0 = arith.constant 0 : i32
    %1 = arith.cmpi eq, %arg1, %c0_i32_0 : i32
    %2 = arith.andi %0, %1 : i1
    %3 = arith.extui %2 : i1 to i32
    %c0_i32_1 = arith.constant 0 : i32
    %4 = arith.cmpi ne, %3, %c0_i32_1 : i32
    scf.if %4 {
      %cst_13 = arith.constant 0.000000e+00 : f32
      %25 = vector.broadcast %cst_13 : f32 to vector<8x128xf32>
      %c0_14 = arith.constant 0 : index
      %c0_15 = arith.constant 0 : index
      %26 = vector.load %arg9[%c0_14, %c0_15] : memref<8x128xf32, #tpu.memory_space<vmem>>, vector<8x128xf32>
      tpu.vector_store %arg9[%c0_14, %c0_15], %25 {strides = array<i32>} : memref<8x128xf32, #tpu.memory_space<vmem>>, vector<8x128xf32>,
    } else {
    }
    %c0 = arith.constant 0 : index
    %c0_2 = arith.constant 0 : index
    %5 = vector.load %arg2[%c0, %c0_2] : memref<256x36xbf16, #tpu.memory_space<vmem>>, vector<256x36xbf16>
    %c0_3 = arith.constant 0 : index
    %c0_4 = arith.constant 0 : index
    %6 = vector.load %arg3[%c0_3, %c0_4] : memref<36x128xbf16, #tpu.memory_space<vmem>>, vector<36x128xbf16>
    %cst = arith.constant dense<0.000000e+00> : vector<256x128xf32>
    %7 = tpu.matmul %5, %6, %cst {dimension_numbers = #tpu.dot_dimension_numbers<[1], [0], [0], [1], [0, 0, 1, 1], [], []>} : vector<256x36xbf16>, vector<36x128xbf16>, vector<256x128xf32> -> vector<256x128xf32>
    %c0_5 = arith.constant 0 : index
    %c0_6 = arith.constant 0 : index
    %8 = vector.load %arg4[%c0_5, %c0_6] : memref<1x128xf32, #tpu.memory_space<vmem>>, vector<1x128xf32>
    %9 = vector.broadcast %8 : vector<1x128xf32> to vector<256x128xf32>
    %10 = arith.addf %7, %9 : vector<256x128xf32>
    %cst_7 = arith.constant 0.000000e+00 : f32
    %11 = vector.broadcast %cst_7 : f32 to vector<256x128xf32>
    %12 = arith.maximumf %10, %11 : vector<256x128xf32>
    %cst_8 = arith.constant dense<0.000000e+00> : vector<128xf32>
    %13 = vector.multi_reduction <add>, %12, %cst_8 [0] : vector<256x128xf32> to vector<128xf32>
    %14 = vector.shape_cast %13 : vector<128xf32> to vector<1x128xf32>
    %15 = arith.index_cast %arg0 : i32 to index
    %c0_9 = arith.constant 0 : index
    %16 = vector.load %arg9[%15, %c0_9] : memref<8x128xf32, #tpu.memory_space<vmem>>, vector<1x128xf32>
    %17 = arith.addf %16, %14 : vector<1x128xf32>
    %18 = arith.index_cast %arg0 : i32 to index
    %c0_10 = arith.constant 0 : index
    %19 = vector.load %arg9[%18, %c0_10] : memref<8x128xf32, #tpu.memory_space<vmem>>, vector<1x128xf32>
    tpu.vector_store %arg9[%18, %c0_10], %17 {strides = array<i32>} : memref<8x128xf32, #tpu.memory_space<vmem>>, vector<1x128xf32>,
    %c1_i32 = arith.constant 1 : i32
    %20 = arith.cmpi eq, %arg0, %c1_i32 : i32
    %c0_i32_11 = arith.constant 0 : i32
    %21 = arith.cmpi eq, %arg1, %c0_i32_11 : i32
    %22 = arith.andi %20, %21 : i1
    %23 = arith.extui %22 : i1 to i32
    %c0_i32_12 = arith.constant 0 : i32
    %24 = arith.cmpi ne, %23, %c0_i32_12 : i32
    scf.if %24 {
      %c0_13 = arith.constant 0 : index
      %c0_14 = arith.constant 0 : index
      %25 = vector.load %arg9[%c0_13, %c0_14] : memref<8x128xf32, #tpu.memory_space<vmem>>, vector<8x128xf32>
      %cst_15 = arith.constant 3.906250e-03 : f32
      %26 = vector.broadcast %cst_15 : f32 to vector<8x128xf32>
      %27 = arith.mulf %25, %26 : vector<8x128xf32>
      %c0_16 = arith.constant 0 : index
      %c0_17 = arith.constant 0 : index
      %28 = vector.load %arg7[%c0_16, %c0_17] : memref<8x128xf32, #tpu.memory_space<vmem>>, vector<8x128xf32>
      tpu.vector_store %arg7[%c0_16, %c0_17], %27 {strides = array<i32>} : memref<8x128xf32, #tpu.memory_space<vmem>>, vector<8x128xf32>,
      %29 = arith.truncf %27 : vector<8x128xf32> to vector<8x128xbf16>
      %c0_18 = arith.constant 0 : index
      %c0_19 = arith.constant 0 : index
      %30 = vector.load %arg5[%c0_18, %c0_19] : memref<128x128xbf16, #tpu.memory_space<vmem>>, vector<128x128xbf16>
      %cst_20 = arith.constant dense<0.000000e+00> : vector<8x128xf32>
      %31 = tpu.matmul %29, %30, %cst_20 {dimension_numbers = #tpu.dot_dimension_numbers<[1], [0], [0], [1], [0, 0, 1, 1], [], []>} : vector<8x128xbf16>, vector<128x128xbf16>, vector<8x128xf32> -> vector<8x128xf32>
      %c0_21 = arith.constant 0 : index
      %c0_22 = arith.constant 0 : index
      %32 = vector.load %arg6[%c0_21, %c0_22] : memref<1x128xf32, #tpu.memory_space<vmem>>, vector<1x128xf32>
      %33 = vector.broadcast %32 : vector<1x128xf32> to vector<8x128xf32>
      %34 = arith.addf %31, %33 : vector<8x128xf32>
      %c0_23 = arith.constant 0 : index
      %c0_24 = arith.constant 0 : index
      %35 = vector.load %arg8[%c0_23, %c0_24] : memref<8x128xf32, #tpu.memory_space<vmem>>, vector<8x128xf32>
      tpu.vector_store %arg8[%c0_23, %c0_24], %34 {strides = array<i32>} : memref<8x128xf32, #tpu.memory_space<vmem>>, vector<8x128xf32>,
    } else {
    }
    return
  }
  func.func @transform_0(%arg0: i32, %arg1: i32) -> (i32, i32) {
    %c1_i32 = arith.constant 1 : i32
    %0 = arith.muli %arg0, %c1_i32 : i32
    %1 = arith.addi %0, %arg1 : i32
    %c0_i32 = arith.constant 0 : i32
    %c0_i32_0 = arith.constant 0 : i32
    return %1, %c0_i32 : i32, i32
  }
  func.func @transform_1(%arg0: i32, %arg1: i32) -> (i32, i32) {
    %c0_i32 = arith.constant 0 : i32
    %c0_i32_0 = arith.constant 0 : i32
    %c0_i32_1 = arith.constant 0 : i32
    return %c0_i32, %c0_i32_0 : i32, i32
  }
  func.func @transform_2(%arg0: i32, %arg1: i32) -> (i32, i32) {
    %c0_i32 = arith.constant 0 : i32
    %c0_i32_0 = arith.constant 0 : i32
    %c0_i32_1 = arith.constant 0 : i32
    return %c0_i32, %c0_i32_0 : i32, i32
  }
  func.func @transform_3(%arg0: i32, %arg1: i32) -> (i32, i32) {
    %c0_i32 = arith.constant 0 : i32
    %c0_i32_0 = arith.constant 0 : i32
    %c0_i32_1 = arith.constant 0 : i32
    return %c0_i32, %c0_i32_0 : i32, i32
  }
  func.func @transform_4(%arg0: i32, %arg1: i32) -> (i32, i32) {
    %c0_i32 = arith.constant 0 : i32
    %c0_i32_0 = arith.constant 0 : i32
    %c0_i32_1 = arith.constant 0 : i32
    return %c0_i32, %c0_i32_0 : i32, i32
  }
  func.func @transform_5(%arg0: i32, %arg1: i32) -> (i32, i32) {
    %c0_i32 = arith.constant 0 : i32
    %c0_i32_0 = arith.constant 0 : i32
    %c0_i32_1 = arith.constant 0 : i32
    return %c0_i32, %c0_i32_0 : i32, i32
  }
  func.func @transform_6(%arg0: i32, %arg1: i32) -> (i32, i32) {
    %c0_i32 = arith.constant 0 : i32
    %c0_i32_0 = arith.constant 0 : i32
    %c0_i32_1 = arith.constant 0 : i32
    return %c0_i32, %c0_i32_0 : i32, i32
  }
}

</mosaic_0001>

<bundles_post_ra>
// kernel: tpu_custom_call.1
= control target key start
LH: loop header
LB: loop body
LE: loop exit
PB: predicated region body
PF: predicated region fallthrough
CT: control target
= control target key end

     0   :  { %12 = vsyncpa [#allocation4], 0  ;;  %s1420_s0 = inlined_call_operand.vmem [shape: bf16[512,36], index: 0, kind: input, shape index: {}]   ;;  %s1421_s1 = inlined_call_operand.vmem [shape: bf16[36,128], index: 1, kind: input, shape index: {}]   ;;  %s1422_s2 = inlined_call_operand.vmem [shape: f32[1,128], index: 2, kind: input, shape index: {}]   ;;  %s1423_s3 = inlined_call_operand.vmem [shape: bf16[128,128], index: 3, kind: input, shape index: {}]   ;;  %s1424_s4 = inlined_call_operand.vmem [shape: f32[1,128], index: 4, kind: input, shape index: {}]   ;;  %s1425_s5 = inlined_call_operand.hbm [shape: f32[8,128], index: 5, kind: output, shape index: {0}]   ;;  %s1426_s6 = inlined_call_operand.hbm [shape: f32[8,128], index: 6, kind: output, shape index: {1}]  }
   0x1   :  { %13 = vsyncpa [#allocation6], 0  ;;  %s1234_s21 = smov 0   ;;  %s1236_s22 = smov 0  }
   0x2   :  { %s1238_s23 = smov 0  }
   0x3 LB: > { %s891_s24 = sadd.s32 4294967295, %s1192_s23   ;;  %s31_s25 = sadd.s32 1, %s1188_s22  ;;  %s1192_s23 = sphi %s1238_s23, %s19_s23   ;;  %s1188_s22 = sphi %s1236_s22, %s1429_s22   ;;  %s1184_s21 = sphi %s1234_s21, %s1428_s21  }
   0x4   : > { %p33_p0 = scmp.ge.s32.totalorder %s31_s25, 2  ;;  %p894_p1 = scmp.ge.s32.totalorder %s1192_s23, 1 }
   0x5   : > { %p224_p2 = scmp.lt.s32.totalorder %s1192_s23, 3 }
   0x6   : > { %s1431_s25 = smov (%p33_p0, %s31_s25), 0 }
   0x7   : > { %p225_p3 = pnand %p894_p1, %p224_p2 }
   0x8   : > { %s895_s26 = sshll.u32 (!%p225_p3), %s1184_s21, 5  ;;  %p259_p4 = scmp.eq.s32.totalorder (!%p225_p3), %s1184_s21, 0 }
   0x9   : > { %228 = sbr.rel (%p225_p3) target bundleno = 550 (0x226), region = 40  ;;  %p252_p5 = scmp.lt.s32.totalorder (!%p225_p3), %s895_s26, 63 }
   0xe   : > { %s1433_s26 = smov (!%p252_p5, %s895_s26), 63  ;;  %264 = sbr.rel (!%p259_p4) target bundleno = 19 (0x13), region = 44  ;;  %v1194_v0 = vmov (%p259_p4), 0.0  }
   0xf   : > { %s896_s27 = sshll.u32 %s1433_s26, 2  ;;  %265 = vst [vmem:[#allocation2] sm:$0xff] (%p259_p4), %v1194_v0 }
  0x10   : > { %s1260_s30 = scalar_lea.vmem %s1420_s0, %s896_s27 }
  0x13 PF: > { %v1087_v1 = vld [vmem:[%s1421_s1 + $0x10] ss:$0 sps:$4 sm:$0x33]   ;;  %vm454_vm0 = vcmask 1041408   ;;  %v1088_v2 = vld [vmem:[%s1421_s1 + $0x8] sm:$0xff]   ;;  %vm405_vm1 = vcmask 293888  }
  0x14   : > { %1044 = vmatprep.subr.msk.bf16.mxu0 %vm454_vm0, %v1087_v1  ;;  %v456_v3 = vsel %vm454_vm0, %v1087_v1, 0  ;;  %1045 = vmatprep.subr.msk.bf16.mxu1 %vm454_vm0, %v1087_v1  ;;  %v1090_v4 = vld [vmem:[%s1260_s30] sm:$0xff]   ;;  %v1091_v6 = vld [vmem:[%s1260_s30 + $0x8] sm:$0xff]   ;;  %v1092_v7 = vld [vmem:[%s1260_s30 + $0x10] sm:$0xff]   ;;  %p692_p6 = scmp.eq.s32.totalorder %s1184_s21, 1  ;;  %s688_s15 = scalar_lea.vmem [#allocation2], %s1184_s21 }
  0x15   : > { %981 = vmatpush3.bf16.msra.mxu0 %v456_v3  ;;  %1041 = vmatpush3.bf16.msra.mxu1 %v456_v3  ;;  %v1089_v5 = vld [vmem:[%s1421_s1] sm:$0xff]   ;;  %v1099_v9 = vld [vmem:[%s1260_s30 + $0x48] sm:$0xff]   ;;  %v1100_v10 = vld [vmem:[%s1260_s30 + $0x50] sm:$0xff]   ;;  %vm1196_vm2 = vmmov (%p692_p6), 0  }
  0x16   : > { %982 = vmatprep.subr.bf16.mxu0 %v1088_v2  ;;  %1039 = vmatprep.subr.bf16.mxu1 %v1088_v2  ;;  %v1098_v8 = vld [vmem:[%s1260_s30 + $0x40] sm:$0xff]   ;;  %v1093_v11 = vld [vmem:[%s1260_s30 + $0x18] sm:$0xff]   ;;  %v1095_v15 = vld [vmem:[%s1260_s30 + $0x28] sm:$0xff]  }
  0x17   : > { %986 = vmatprep.mubr.msk.bf16.mxu0 %vm405_vm1, %v1090_v4  ;;  %1002 = vmatprep.mubr.msk.bf16.mxu1 %vm405_vm1, %v1098_v8  ;;  %v1101_v12 = vld [vmem:[%s1260_s30 + $0x58] sm:$0xff]   ;;  %v1094_v13 = vld [vmem:[%s1260_s30 + $0x20] sm:$0xff]   ;;  %v1103_v16 = vld [vmem:[%s1260_s30 + $0x68] sm:$0xff]  }
  0x18   : > { %v1102_v14 = vld [vmem:[%s1260_s30 + $0x60] sm:$0xff]   ;;  %v1096_v17 = vld [vmem:[%s1260_s30 + $0x30] sm:$0xff]   ;;  %v1097_v19 = vld [vmem:[%s1260_s30 + $0x38] sm:$0xff]  }
  0x19   : > { %983 = vmatpush3.bf16.msra.mxu0 %v1088_v2  ;;  %1042 = vmatpush3.bf16.msra.mxu1 %v1088_v2  ;;  %v1104_v18 = vld [vmem:[%s1260_s30 + $0x70] sm:$0xff]   ;;  %v1105_v20 = vld [vmem:[%s1260_s30 + $0x78] sm:$0xff]   ;;  %v1311_v25 = vld [vmem:[%s1422_s2] ss:$0 sm:$0xff] }
  0x1a   : > { %984 = vmatprep.subr.bf16.mxu0 %v1089_v5  ;;  %1040 = vmatprep.subr.bf16.mxu1 %v1089_v5 }
  0x1d   : > { %985 = vmatpush3.bf16.msra.mxu0 %v1089_v5  ;;  %1043 = vmatpush3.bf16.msra.mxu1 %v1089_v5 }
  0x20   : > { %987 = vmatmul.mubr.msk.bf16.vlgmr.msra.gmra.mxu0 %vm405_vm1, %v1091_v6  ;;  %1003 = vmatmul.mubr.msk.bf16.vlgmr.msra.gmra.mxu1 %vm405_vm1, %v1099_v9 }
  0x21   : > { %990 = vmatprep.mubr.msk.bf16.mxu0 %vm405_vm1, %v1092_v7  ;;  %1006 = vmatprep.mubr.msk.bf16.mxu1 %vm405_vm1, %v1100_v10 }
  0x28   : > { %991 = vmatmul.mubr.msk.bf16.gmra.mxu0 %vm405_vm1, %v1093_v11  ;;  %1007 = vmatmul.mubr.msk.bf16.gmra.mxu1 %vm405_vm1, %v1101_v12 }
  0x29   : > { %994 = vmatprep.mubr.msk.bf16.mxu0 %vm405_vm1, %v1094_v13  ;;  %1010 = vmatprep.mubr.msk.bf16.mxu1 %vm405_vm1, %v1102_v14 }
  0x30   : > { %995 = vmatmul.mubr.msk.bf16.gmra.mxu0 %vm405_vm1, %v1095_v15  ;;  %1011 = vmatmul.mubr.msk.bf16.gmra.mxu1 %vm405_vm1, %v1103_v16 }
  0x31   : > { %998 = vmatprep.mubr.msk.bf16.mxu0 %vm405_vm1, %v1096_v17  ;;  %1014 = vmatprep.mubr.msk.bf16.mxu1 %vm405_vm1, %v1104_v18 }
  0x38   : > { %999 = vmatmul.mubr.msk.bf16.gmra.mxu0 %vm405_vm1, %v1097_v19  ;;  %1015 = vmatmul.mubr.msk.bf16.gmra.mxu1 %vm405_vm1, %v1105_v20 }
  0xe0   : > { %v988_v21 = vpop.f32.mrf.mxu0  ;;  %v1304_v22 = vpop.f32.mrf.mxu1 }
  0xe1   : > { %v501_v30 = vadd.f32 %v988_v21, %v1311_v25 }
  0xe2   : > { %v492_v23 = vpop.f32.mrf.mxu0  ;;  %v1306_v24 = vpop.f32.mrf.mxu1 }
  0xe3   : > { %v493_v27 = vadd.f32 %v1311_v25, %v492_v23  ;;  %v621_v38 = vmax.f32 %v501_v30, 0.0 }
  0xe4   : > { %v989_v26 = vpop.f32.mrf.mxu0  ;;  %v1314_v29 = vpop.f32.mrf.mxu1 }
  0xe5   : > { %v619_v33 = vmax.f32 %v493_v27, 0.0  ;;  %v504_v34 = vadd.f32 %v989_v26, %v1311_v25 }
  0xe6   : > { %v495_v28 = vpop.f32.mrf.mxu0  ;;  %v559_v37 = vpop.f32.mrf.mxu1 }
  0xe7   : > { %v496_v31 = vadd.f32 %v1311_v25, %v495_v28  ;;  %v622_v42 = vmax.f32 %v504_v34, 0.0 }
  0xe8   : > { %v992_v32 = vpop.f32.mrf.mxu0  ;;  %v1320_v45 = vpop.f32.mrf.mxu1 }
  0xe9   : > { %v620_v35 = vmax.f32 %v496_v31, 0.0  ;;  %v517_v46 = vadd.f32 %v992_v32, %v1311_v25  ;;  %v557_v31 = vadd.f32 %v1311_v25, %v1306_v24 }
  0xea   : > { %v508_v36 = vpop.f32.mrf.mxu0  ;;  %v572_v55 = vpop.f32.mrf.mxu1 }
  0xeb   : > { %v651_v39 = vadd.f32 %v620_v35, %v619_v33  ;;  %v509_v40 = vadd.f32 %v1311_v25, %v508_v36  ;;  %v625_v56 = vmax.f32 %v517_v46, 0.0  ;;  %v560_v35 = vadd.f32 %v1311_v25, %v559_v37 }
  0xec   : > { %v993_v41 = vpop.f32.mrf.mxu0  ;;  %v1009_v63 = vpop.f32.mrf.mxu1  ;;  %v573_v24 = vadd.f32 %v1311_v25, %v572_v55 }
  0xed   : > { %v652_v43 = vadd.f32 %v651_v39, %v621_v38  ;;  %v623_v47 = vmax.f32 %v509_v40, 0.0  ;;  %v520_v52 = vadd.f32 %v993_v41, %v1311_v25  ;;  %v565_v38 = vadd.f32 %v1304_v22, %v1311_v25 }
  0xee   : > { %v511_v44 = vpop.f32.mrf.mxu0  ;;  %v575_v9 = vpop.f32.mrf.mxu1  ;;  %v635_v39 = vmax.f32 %v557_v31, 0.0  ;;  %v568_v41 = vadd.f32 %v1314_v29, %v1311_v25  ;;  %v581_v22 = vadd.f32 %v1320_v45, %v1311_v25  ;;  %v584_v29 = vadd.f32 %v1009_v63, %v1311_v25  ;;  %v689_v31 = vld [vmem:[%s688_s15] sm:$0x1] }
  0xef   : > { %v653_v48 = vadd.f32 %v652_v43, %v622_v42  ;;  %v512_v49 = vadd.f32 %v1311_v25, %v511_v44  ;;  %v626_v60 = vmax.f32 %v520_v52, 0.0  ;;  %v636_v42 = vmax.f32 %v560_v35, 0.0  ;;  %v1107_v35 = vld [vmem:[%s1423_s3 + $0x30] sm:$0xff] (%p692_p6)  }
  0xf0   : > { %v996_v50 = vpop.f32.mrf.mxu0  ;;  %v1012_v17 = vpop.f32.mrf.mxu1  ;;  %v637_v46 = vmax.f32 %v565_v38, 0.0  ;;  %v576_v37 = vadd.f32 %v1311_v25, %v575_v9  ;;  %v642_v55 = vmax.f32 %v584_v29, 0.0 }
  0xf1   : > { %v654_v51 = vadd.f32 %v653_v48, %v623_v47  ;;  %v624_v53 = vmax.f32 %v512_v49, 0.0  ;;  %v533_v0 = vadd.f32 %v996_v50, %v1311_v25  ;;  %v638_v48 = vmax.f32 %v568_v41, 0.0  ;;  %v1110_v41 = vld [vmem:[%s1423_s3 + $0x18] sm:$0xff] (%p692_p6)  }
  0xf2   : > { %v524_v54 = vpop.f32.mrf.mxu0  ;;  %v588_v28 = vpop.f32.mrf.mxu1 }
  0xf3   : > { %v655_v57 = vadd.f32 %v654_v51, %v624_v53  ;;  %v525_v58 = vadd.f32 %v1311_v25, %v524_v54  ;;  %v629_v10 = vmax.f32 %v533_v0, 0.0  ;;  %v639_v51 = vmax.f32 %v573_v24, 0.0 }
  0xf4   : > { %v997_v59 = vpop.f32.mrf.mxu0  ;;  %v1013_v36 = vpop.f32.mrf.mxu1  ;;  %v640_v54 = vmax.f32 %v576_v37, 0.0  ;;  %v597_v0 = vadd.f32 %v1012_v17, %v1311_v25 }
  0xf5   : > { %v656_v61 = vadd.f32 %v655_v57, %v625_v56  ;;  %v627_v1 = vmax.f32 %v525_v58, 0.0  ;;  %v536_v6 = vadd.f32 %v997_v59, %v1311_v25  ;;  %v641_v57 = vmax.f32 %v581_v22, 0.0 }
  0xf6   : > { %v527_v62 = vpop.f32.mrf.mxu0  ;;  %v591_v44 = vpop.f32.mrf.mxu1  ;;  %v589_v59 = vadd.f32 %v1311_v25, %v588_v28 }
  0xf7   : > { %v657_v2 = vadd.f32 %v656_v61, %v626_v60  ;;  %v528_v3 = vadd.f32 %v1311_v25, %v527_v62  ;;  %v630_v14 = vmax.f32 %v536_v6, 0.0  ;;  %v592_v61 = vadd.f32 %v1311_v25, %v591_v44  ;;  %v1113_v44 = vld [vmem:[%s1423_s3] sm:$0xff] (%p692_p6)  }
  0xf8   : > { %v1000_v4 = vpop.f32.mrf.mxu0  ;;  %v1016_v50 = vpop.f32.mrf.mxu1 }
  0xf9   : > { %v658_v5 = vadd.f32 %v657_v2, %v627_v1  ;;  %v628_v7 = vmax.f32 %v528_v3, 0.0  ;;  %v549_v18 = vadd.f32 %v1000_v4, %v1311_v25  ;;  %v643_v1 = vmax.f32 %v589_v59, 0.0 }
  0xfa   : > { %v540_v8 = vpop.f32.mrf.mxu0  ;;  %v604_v56 = vpop.f32.mrf.mxu1  ;;  %v600_v3 = vadd.f32 %v1013_v36, %v1311_v25  ;;  %v644_v4 = vmax.f32 %v592_v61, 0.0  ;;  %v1108_v36 = vld [vmem:[%s1423_s3 + $0x28] sm:$0xff] (%p692_p6)  }
  0xfb   : > { %v659_v11 = vadd.f32 %v658_v5, %v628_v7  ;;  %v541_v12 = vadd.f32 %v1311_v25, %v540_v8  ;;  %v633_v30 = vmax.f32 %v549_v18, 0.0  ;;  %v645_v5 = vmax.f32 %v597_v0, 0.0 }
  0xfc   : > { %v1001_v13 = vpop.f32.mrf.mxu0  ;;  %v1017_v62 = vpop.f32.mrf.mxu1  ;;  %v605_v7 = vadd.f32 %v1311_v25, %v604_v56  ;;  %v646_v8 = vmax.f32 %v600_v3, 0.0 }
  0xfd   : > { %v660_v15 = vadd.f32 %v659_v11, %v629_v10  ;;  %v631_v19 = vmax.f32 %v541_v12, 0.0  ;;  %v552_v26 = vadd.f32 %v1001_v13, %v1311_v25  ;;  %v613_v11 = vadd.f32 %v1016_v50, %v1311_v25 }
  0xfe   : > { %v543_v16 = vpop.f32.mrf.mxu0  ;;  %v607_v63 = vpop.f32.mrf.mxu1  ;;  %v647_v12 = vmax.f32 %v605_v7, 0.0 }
  0xff   : > { %v661_v20 = vadd.f32 %v660_v15, %v630_v14  ;;  %v544_v21 = vadd.f32 %v1311_v25, %v543_v16  ;;  %v634_v33 = vmax.f32 %v552_v26, 0.0  ;;  %v608_v10 = vadd.f32 %v1311_v25, %v607_v63 }
 0x100   : > { %v616_v15 = vadd.f32 %v1017_v62, %v1311_v25  ;;  %v649_v17 = vmax.f32 %v613_v11, 0.0  ;;  %v1106_v25 = vld [vmem:[%s1423_s3 + $0x38] sm:$0xff] (%p692_p6)  }
 0x101   : > { %v662_v23 = vadd.f32 %v661_v20, %v631_v19  ;;  %v632_v27 = vmax.f32 %v544_v21, 0.0  ;;  %v648_v16 = vmax.f32 %v608_v10, 0.0 }
 0x102   : > { %v650_v19 = vmax.f32 %v616_v15, 0.0 }
 0x103   : > { %v663_v32 = vadd.f32 %v662_v23, %v632_v27 }
 0x105   : > { %v664_v34 = vadd.f32 %v663_v32, %v633_v30 }
 0x107   : > { %v665_v40 = vadd.f32 %v664_v34, %v634_v33  ;;  %v1195_v34 = vmov (%p692_p6), 0.0  }
 0x108   : > { %1018 = vmatprep.subr.bf16.mxu0 (%p692_p6), %v1195_v34  ;;  %1034 = vmatprep.mubr.msk.bf16.mxu0 (%p692_p6), %vm1196_vm2, %v1195_v34 }
 0x109   : > { %v666_v43 = vadd.f32 %v665_v40, %v635_v39  ;;  %1019 = vmatpush3.bf16.msra.mxu0 (%p692_p6), %v1106_v25  ;;  %v1109_v40 = vld [vmem:[%s1423_s3 + $0x20] sm:$0xff] (%p692_p6)  }
 0x10a   : > { %1020 = vmatprep.subr.bf16.mxu0 (%p692_p6), %v1195_v34 }
 0x10b   : > { %v667_v47 = vadd.f32 %v666_v43, %v636_v42  ;;  %v1111_v42 = vld [vmem:[%s1423_s3 + $0x10] sm:$0xff] (%p692_p6)   ;;  %v1112_v43 = vld [vmem:[%s1423_s3 + $0x8] sm:$0xff] (%p692_p6)  }
 0x10d   : > { %v668_v49 = vadd.f32 %v667_v47, %v637_v46  ;;  %1021 = vmatpush3.bf16.msra.mxu0 (%p692_p6), %v1107_v35  ;;  %v935_v47 = vld [vmem:[%s1424_s4] ss:$0 sm:$0xff] (%p692_p6) }
 0x10e   : > { %1022 = vmatprep.subr.bf16.mxu0 (%p692_p6), %v1195_v34 }
 0x10f   : > { %v669_v52 = vadd.f32 %v668_v49, %v638_v48 }
 0x111   : > { %v670_v53 = vadd.f32 %v669_v52, %v639_v51  ;;  %1023 = vmatpush3.bf16.msra.mxu0 (%p692_p6), %v1108_v36 }
 0x112   : > { %1024 = vmatprep.subr.bf16.mxu0 (%p692_p6), %v1195_v34 }
 0x113   : > { %v671_v58 = vadd.f32 %v670_v53, %v640_v54 }
 0x115   : > { %v672_v60 = vadd.f32 %v671_v58, %v641_v57  ;;  %1025 = vmatpush3.bf16.msra.mxu0 (%p692_p6), %v1109_v40 }
 0x116   : > { %1026 = vmatprep.subr.bf16.mxu0 (%p692_p6), %v1195_v34 }
 0x117   : > { %v673_v45 = vadd.f32 %v672_v60, %v642_v55 }
 0x119   : > { %v674_v2 = vadd.f32 %v673_v45, %v643_v1  ;;  %1027 = vmatpush3.bf16.msra.mxu0 (%p692_p6), %v1110_v41 }
 0x11a   : > { %1028 = vmatprep.subr.bf16.mxu0 (%p692_p6), %v1195_v34 }
 0x11b   : > { %v675_v6 = vadd.f32 %v674_v2, %v644_v4 }
 0x11d   : > { %v676_v9 = vadd.f32 %v675_v6, %v645_v5  ;;  %1029 = vmatpush3.bf16.msra.mxu0 (%p692_p6), %v1111_v42 }
 0x11e   : > { %1030 = vmatprep.subr.bf16.mxu0 (%p692_p6), %v1195_v34 }
 0x11f   : > { %v677_v13 = vadd.f32 %v676_v9, %v646_v8 }
 0x121   : > { %v678_v14 = vadd.f32 %v677_v13, %v647_v12  ;;  %1031 = vmatpush3.bf16.msra.mxu0 (%p692_p6), %v1112_v43 }
 0x122   : > { %1032 = vmatprep.subr.bf16.mxu0 (%p692_p6), %v1195_v34 }
 0x123   : > { %v679_v18 = vadd.f32 %v678_v14, %v648_v16 }
 0x125   : > { %v680_v20 = vadd.f32 %v679_v18, %v649_v17  ;;  %1033 = vmatpush3.bf16.msra.mxu0 (%p692_p6), %v1113_v44 }
 0x127   : > { %v681_v21 = vadd.f32 %v680_v20, %v650_v19 }
 0x129   : > { %v682_v23 = vrot.slane %v681_v21, 4 }
 0x12b   : > { %v683_v26 = vadd.f32 %v682_v23, %v681_v21 }
 0x12d   : > { %v684_v27 = vrot.slane %v683_v26, 2 }
 0x12f   : > { %v685_v28 = vadd.f32 %v684_v27, %v683_v26 }
 0x131   : > { %v686_v30 = vrot.slane %v685_v28, 1 }
 0x133   : > { %v687_v32 = vadd.f32 %v686_v30, %v685_v28  ;;  %696 = sbr.rel (!%p692_p6) target bundleno = 522 (0x20a), region = 48 }
 0x135   : > { %v690_v33 = vadd.f32 %v689_v31, %v687_v32 }
 0x137   : > { %691 = vst [vmem:[%s688_s15] sm:$0x1] %v690_v33 }
 0x13e   : > { %v697_v38 = vld [vmem:[#allocation2] sm:$0xff] }
 0x13f   : > { %v698_v39 = vmul.f32 0.00390625, %v697_v38 }
 0x141   : > { %699 = vst [vmem:[#allocation3] sm:$0xff] %v698_v39  ;;  %v700_v46 = vpack.c.bf16 %v698_v39, %v698_v39 }
 0x143   : > { %1035 = vmatmul.mubr.bf16.vlgmr.msra.gmra.mxu0 %v700_v46 }
 0x203   : > { %v806_v24 = vpop.f32.mrf.mxu0 }
 0x204   : > { %v807_v48 = vadd.f32 %v935_v47, %v806_v24 }
 0x205   : > { %v1036_v49 = vpop.f32.mrf.mxu0 }
 0x206   : > { %812 = vst [vmem:[#allocation5] sm:$0xff] %v807_v48 }
 0x207   : > { %v809_v37 = vpop.f32.mrf.mxu0 }
 0x209   : > { %v1037_v50 = vpop.f32.mrf.mxu0 }
 0x20a PF: > { %p1385_p7 = scmp.eq.s32.totalorder %s891_s24, 1  ;;  %s1197_s15 = smov [#allocation3]  }
 0x20b   : > { %s820_s16 = sshll.u32 %s1197_s15, 4  ;;  %s1198_s17 = smov [#allocation5]   ;;  %s821_s16 = int_to_ptr.vmem [resolvable:$true] %s820_s16 }
 0x20c   : > { %s831_s18 = sshll.u32 %s1198_s17, 4  ;;  %s1114_s19 = scalar_lea.vmem %s821_s16, 128  ;;  %s832_s18 = int_to_ptr.vmem [resolvable:$true] %s831_s18 }
 0x20d   : > { %p1115_p8 = scmp.ne.s32.totalorder %s821_s16, %s1114_s19  ;;  %p1121_p11 = scmp.lt.s32.totalorder %s821_s16, %s821_s16 }
 0x20e   : > { %p1122_p12 = scmp.lt.s32.totalorder %s1114_s19, %s1114_s19 }
 0x20f   : > { %p1116_p9 = pnand %p1115_p8, %p1385_p7 }
 0x210   : > { %p1123_p13 = por %p1122_p12, %p1121_p11 }
 0x211   : > { %p1117_p10 = pneg %p1116_p9 }
 0x213   : > { %p1124_p0 = pnand %p1123_p13, %p1117_p10 }
 0x215   : > { %1127 = shalt.err (!%p1124_p0)
}
 0x216   : > { %1047 = dma.vmem_to_hbm [thread:$0]  (%p1385_p7), %s821_s16, 128, %s1425_s5, [#allocation4]  }
 0x217   : > { %s1138_s26 = scalar_lea.vmem %s832_s18, 128  ;;  %p1145_p4 = scmp.lt.s32.totalorder %s832_s18, %s832_s18 }
 0x218   : > { %p1139_p1 = scmp.ne.s32.totalorder %s832_s18, %s1138_s26  ;;  %p1146_p5 = scmp.lt.s32.totalorder %s1138_s26, %s1138_s26 }
 0x21a   : > { %p1140_p2 = pnand %p1139_p1, %p1385_p7  ;;  %p1147_p6 = por %p1146_p5, %p1145_p4 }
 0x21c   : > { %p1141_p3 = pneg %p1140_p2 }
 0x21e   : > { %p1148_p8 = pnand %p1147_p6, %p1141_p3 }
 0x220   : > { %1151 = shalt.err (!%p1148_p8)
}
 0x221   : > { %1049 = dma.vmem_to_hbm [thread:$0]  (%p1385_p7), %s832_s18, 128, %s1426_s6, [#allocation6]  }
 0x222   : > { %1175 = dma.done.wait (%p1385_p7), [#allocation4], 128  }
 0x223   : > { %1177 = vsyncadd (%p1385_p7), [#allocation4], 4294967168 }
 0x224   : > { %1179 = dma.done.wait (%p1385_p7), [#allocation6], 128  }
 0x225   : > { %1181 = vsyncadd (%p1385_p7), [#allocation6], 4294967168 }
 0x226 PF: > { %s19_s23 = sadd.s32 1, %s1192_s23   ;;  %s1428_s21 = smov %s1188_s22 }
 0x227   : > { %p16_p9 = scmp.ge.s32.totalorder %s19_s23, 4   ;;  %s1429_s22 = smov %s1431_s25 }
 0x229   :  { %18 = sbr.rel (!%p16_p9) target bundleno = 3 (0x3), region = 84 }
 0x22e   :  { %848 = vsyncpa [#allocation4], 1 }
 0x22f   :  { %850 = vsyncpa [#allocation4 + $0x1], 1 }
 0x230   :  { %851 = vsyncpa [#allocation6], 1 }

</bundles_post_ra>
